<compile_context>
chip_gen: v6e
topology: v6e:2x2x1
jax: 0.10.0
libtpu: 0.0.40
codegen_flags: <defaults>
</compile_context>

<pallas_src>
import functools
import math

import jax
import jax.numpy as jnp
import numpy as np
from jax.experimental import pallas as pl
from jax.experimental.pallas import tpu as pltpu

# ----------------------------- configuration --------------------------------
D_IN = 8
DIMS = [64, 64, 64]
SKIP_IN = (2,)
D_OUT = 4
RADIUS_INIT = 0.3
OUTPUT_INIT_GAIN = 2.0
NUM_POSITION_INPUTS = 3
SDF_SCALE = 1.0
# combine_layer default = 1000 > num_layers, so util.combine_interleaved is never
# reached for this config.
# TODO(synk): combine_interleaved (multi-view average/max) not implemented since
# the default combine_layer makes it dead code for this forward pass.


def build_layer_dims():
    dims = [D_IN] + DIMS + [D_OUT]
    num_layers = len(dims)
    layer_shapes = []
    for layer in range(num_layers - 1):
        if (layer + 1) in SKIP_IN:
            out_dim = dims[layer + 1] - D_IN
        else:
            out_dim = dims[layer + 1]
        layer_shapes.append((dims[layer], out_dim))
    return dims, layer_shapes


def init_params(key):
    """Geometric init mirroring ImplicitNet.__init__; weights kept in native
    PyTorch (out_features, in_features) layout, bias as (out_features,)."""
    dims, layer_shapes = build_layer_dims()
    num_layers = len(dims)
    params = []
    for layer, (in_dim, out_dim) in enumerate(layer_shapes):
        key, k1, k2 = jax.random.split(key, 3)
        if layer == num_layers - 2:
            mean0 = -math.sqrt(math.pi) / math.sqrt(dims[layer]) * SDF_SCALE
            w_row0 = mean0 + 1e-5 * jax.random.normal(k1, (1, in_dim), dtype=jnp.float32)
            w_rest = OUTPUT_INIT_GAIN * jax.random.normal(
                k2, (out_dim - 1, in_dim), dtype=jnp.float32
            )
            w = jnp.concatenate([w_row0, w_rest], axis=0)
            b = jnp.concatenate(
                [jnp.full((1,), RADIUS_INIT, jnp.float32),
                 jnp.zeros((out_dim - 1,), jnp.float32)]
            )
        else:
            std = math.sqrt(2.0) / math.sqrt(out_dim)
            w = std * jax.random.normal(k1, (out_dim, in_dim), dtype=jnp.float32)
            b = jnp.zeros((out_dim,), jnp.float32)
        if D_IN > NUM_POSITION_INPUTS and (layer == 0 or layer in SKIP_IN):
            w = w.at[:, -(D_IN - NUM_POSITION_INPUTS):].set(0.0)
        params.append((w, b))
    return params


# ------------------------------- kernel --------------------------------------
def mlp_kernel(x_ref, *refs, num_layers, skip_in):
    """Full MLP for one point-tile, feature-major.

    x_ref : (d_in, tm) bf16 -- points on the lane axis.
    refs  : per layer either (w, b) or (w_main, w_skip, b) followed by o_ref.
            Hidden-layer weights are bf16, final-layer weight is f32,
            biases are f32 with shape (out, 1).
    """
    o_ref = refs[-1]
    prm = refs[:-1]
    inv_sqrt2 = np.float32(1.0 / math.sqrt(2.0))

    x_init = x_ref[...]          # bf16 (d_in, tm)
    h = x_init
    idx = 0
    for layer in range(num_layers - 1):
        last = layer == num_layers - 2
        if layer in skip_in:
            w_main = prm[idx][...]
            w_skip = prm[idx + 1][...]
            b = prm[idx + 2][...]
            idx += 3
            # cat([h, x_init], -1)/sqrt(2) @ W.T  ==
            #   (W_main @ h + W_skip @ x_init) / sqrt(2)   (feature-major)
            y = (
                jnp.dot(w_main, h.astype(w_main.dtype),
                        preferred_element_type=jnp.float32)
                + jnp.dot(w_skip, x_init.astype(w_skip.dtype),
                          preferred_element_type=jnp.float32)
            ) * inv_sqrt2
        else:
            w = prm[idx][...]
            b = prm[idx + 1][...]
            idx += 2
            # NOTE: layer 0 has K=d_in=8; could be moved to VPU broadcast-FMAs
            # on v6e/v7x, but the MXU dot is kept for simplicity/robustness.
            y = jnp.dot(w, h.astype(w.dtype), preferred_element_type=jnp.float32)
        y = y + b                                  # bias add in f32
        if not last:
            h = jnp.maximum(y, 0.0)                # beta == 0 -> ReLU, f32
        else:
            h = y
    o_ref[...] = h.astype(o_ref.dtype)             # (D_OUT, tm) lane-dense store


# ------------------------------- wrapper --------------------------------------
def implicit_net_forward(x, params, tm=512):
    """x: (N, d_in) f32 -> (N, d_out) f32."""
    n, d_in = x.shape
    assert d_in == D_IN
    dims, _ = build_layer_dims()
    num_layers = len(dims)

    # --- tile sizing: big lane tiles, keep >=2 grid steps when possible (v7x) ---
    def rd128(v):
        return max(128, (v // 128) * 128)

    tm = rd128(min(max(tm, 128), 2048))
    n128 = pl.cdiv(n, 128) * 128
    if n128 < 2 * tm:
        tm = rd128(n128 // 2) if n128 >= 256 else 128
    n_pad = pl.cdiv(n, tm) * tm
    grid = (n_pad // tm,)

    # --- feature-major, bf16 input: (d_in, n_pad), points on the lane axis ---
    x_fm = jnp.transpose(x).astype(jnp.bfloat16)
    if n_pad != n:
        x_fm = jnp.pad(x_fm, ((0, 0), (0, n_pad - n)))

    # --- pack parameters: (out, in) weights, skip layers pre-split,
    #     bf16 for hidden layers, f32 for the final (geometric-init) layer ---
    # (Weight BlockSpecs have a constant index_map, so they are DMA'd once;
    #  pipeline_mode=pl.Buffered(1) would save ~28 KB of VMEM but is omitted.)
    flat_params = []
    in_specs = [pl.BlockSpec((d_in, tm), lambda i: (0, i))]

    def const_spec(shape):
        return pl.BlockSpec(shape, lambda i: (0, 0))

    for layer, (w, b) in enumerate(params):
        last = layer == num_layers - 2
        w_dt = jnp.float32 if last else jnp.bfloat16
        b2 = b.reshape(-1, 1).astype(jnp.float32)
        if layer in SKIP_IN:
            feat = w.shape[1] - D_IN
            w_main = w[:, :feat].astype(w_dt)
            w_skip = w[:, feat:].astype(w_dt)
            flat_params += [w_main, w_skip, b2]
            in_specs += [const_spec(w_main.shape),
                         const_spec(w_skip.shape),
                         const_spec(b2.shape)]
        else:
            flat_params += [w.astype(w_dt), b2]
            in_specs += [const_spec(w.shape), const_spec(b2.shape)]

    out_specs = pl.BlockSpec((D_OUT, tm), lambda i: (0, i))

    kernel = functools.partial(mlp_kernel, num_layers=num_layers, skip_in=SKIP_IN)
    out_fm = pl.pallas_call(
        kernel,
        out_shape=jax.ShapeDtypeStruct((D_OUT, n_pad), jnp.float32),
        grid_spec=pltpu.PrefetchScalarGridSpec(
            num_scalar_prefetch=0,
            grid=grid,
            in_specs=in_specs,
            out_specs=out_specs,
        ),
        compiler_params=pltpu.CompilerParams(
            dimension_semantics=("parallel",),
        ),
    )(x_fm, *flat_params)

    # back to row-major (N, D_OUT); drop padded points
    return jnp.transpose(out_fm)[:n]


# --------------------------- references -------------------------------------
def implicit_net_ref_mixed(x, params):
    """Mirrors the kernel's math (bf16 matmul inputs, f32 accumulation,
    f32 final layer, skip decomposition)."""
    dims, _ = build_layer_dims()
    num_layers = len(dims)
    inv_sqrt2 = 1.0 / math.sqrt(2.0)
    x_init = x.astype(jnp.bfloat16)
    h = x_init.astype(jnp.float32)
    for layer in range(num_layers - 1):
        w, b = params[layer]
        last = layer == num_layers - 2
        w_dt = jnp.float32 if last else jnp.bfloat16
        if layer in SKIP_IN:
            feat = w.shape[1] - D_IN
            y = (
                jnp.dot(h.astype(w_dt), w[:, :feat].astype(w_dt).T,
                        preferred_element_type=jnp.float32)
                + jnp.dot(x_init.astype(w_dt), w[:, feat:].astype(w_dt).T,
                          preferred_element_type=jnp.float32)
            ) * inv_sqrt2
        else:
            y = jnp.dot(h.astype(w_dt), w.astype(w_dt).T,
                        preferred_element_type=jnp.float32)
        y = y + b
        h = jnp.maximum(y, 0.0) if not last else y
    return h


def implicit_net_ref_f32(x, params):
    """Exact (f32) module semantics: x = cat([x, x_init])/sqrt(2); x = x @ W.T + b."""
    dims, _ = build_layer_dims()
    num_layers = len(dims)
    x_init = x
    h = x
    for layer in range(num_layers - 1):
        w, b = params[layer]
        if layer in SKIP_IN:
            h = jnp.concatenate([h, x_init], axis=-1) / math.sqrt(2.0)
        h = h @ w.T + b
        if layer < num_layers - 2:
            h = jnp.maximum(h, 0.0)
    return h


# --------------------------------- main ----------------------------------------
if __name__ == "__main__":
    key = jax.random.PRNGKey(0)
    key_p, key_x = jax.random.split(key)
    params = init_params(key_p)

    N = 2048  # flattened batch of points (small; gives a 4-step parallel grid at tm=512)
    x = jax.random.normal(key_x, (N, D_IN), dtype=jnp.float32)

    out = jax.block_until_ready(implicit_net_forward(x, params))

    # 1) tight check vs. a reference that mirrors the kernel's bf16/f32 mixed math
    ref_mixed = implicit_net_ref_mixed(x, params)
    np.testing.assert_allclose(np.asarray(out), np.asarray(ref_mixed),
                               rtol=5e-3, atol=5e-3)

    # 2) loose sanity check vs. the exact f32 module semantics
    #    (slack accounts only for bf16 matmul-input precision)
    ref_f32 = implicit_net_ref_f32(x, params)
    np.testing.assert_allclose(np.asarray(out), np.asarray(ref_f32),
                               rtol=1e-1, atol=2e-1)

    print("KERNEL_OK")
</pallas_src>

<mosaic_0001>
module attributes {stable_mosaic.version = 11 : i64} {
  func.func @mlp_kernel(%arg0: i32, %arg1: memref<8x512xbf16, #tpu.memory_space<vmem>>, %arg2: memref<64x8xbf16, #tpu.memory_space<vmem>>, %arg3: memref<64x1xf32, #tpu.memory_space<vmem>>, %arg4: memref<56x64xbf16, #tpu.memory_space<vmem>>, %arg5: memref<56x1xf32, #tpu.memory_space<vmem>>, %arg6: memref<64x56xbf16, #tpu.memory_space<vmem>>, %arg7: memref<64x8xbf16, #tpu.memory_space<vmem>>, %arg8: memref<64x1xf32, #tpu.memory_space<vmem>>, %arg9: memref<4x64xf32, #tpu.memory_space<vmem>>, %arg10: memref<4x1xf32, #tpu.memory_space<vmem>>, %arg11: memref<4x512xf32, #tpu.memory_space<vmem>>) attributes {dimension_semantics = [#tpu.dimension_semantics<parallel>], iteration_bounds = array<i64: 4>, scalar_prefetch = 0 : i64, scratch_operands = 0 : i64, tpu.core_type = #tpu.core_type<tc>, window_params = [{transform_indices = @transform_0, window_bounds = array<i64: 8, 512>}, {pipeline_mode = #tpu.pipeline_mode<synchronous>, transform_indices = @transform_1, window_bounds = array<i64: 64, 8>}, {pipeline_mode = #tpu.pipeline_mode<synchronous>, transform_indices = @transform_2, window_bounds = array<i64: 64, 1>}, {pipeline_mode = #tpu.pipeline_mode<synchronous>, transform_indices = @transform_3, window_bounds = array<i64: 56, 64>}, {pipeline_mode = #tpu.pipeline_mode<synchronous>, transform_indices = @transform_4, window_bounds = array<i64: 56, 1>}, {pipeline_mode = #tpu.pipeline_mode<synchronous>, transform_indices = @transform_5, window_bounds = array<i64: 64, 56>}, {pipeline_mode = #tpu.pipeline_mode<synchronous>, transform_indices = @transform_6, window_bounds = array<i64: 64, 8>}, {pipeline_mode = #tpu.pipeline_mode<synchronous>, transform_indices = @transform_7, window_bounds = array<i64: 64, 1>}, {pipeline_mode = #tpu.pipeline_mode<synchronous>, transform_indices = @transform_8, window_bounds = array<i64: 4, 64>}, {pipeline_mode = #tpu.pipeline_mode<synchronous>, transform_indices = @transform_9, window_bounds = array<i64: 4, 1>}, {transform_indices = @transform_10, window_bounds = array<i64: 4, 512>}]} {
    %c0 = arith.constant 0 : index
    %c0_0 = arith.constant 0 : index
    %0 = vector.load %arg1[%c0, %c0_0] : memref<8x512xbf16, #tpu.memory_space<vmem>>, vector<8x512xbf16>
    %c0_1 = arith.constant 0 : index
    %c0_2 = arith.constant 0 : index
    %1 = vector.load %arg2[%c0_1, %c0_2] : memref<64x8xbf16, #tpu.memory_space<vmem>>, vector<64x8xbf16>
    %c0_3 = arith.constant 0 : index
    %c0_4 = arith.constant 0 : index
    %2 = vector.load %arg3[%c0_3, %c0_4] : memref<64x1xf32, #tpu.memory_space<vmem>>, vector<64x1xf32>
    %cst = arith.constant dense<0.000000e+00> : vector<64x512xf32>
    %3 = tpu.matmul %1, %0, %cst {dimension_numbers = #tpu.dot_dimension_numbers<[1], [0], [0], [1], [0, 0, 1, 1], [], []>} : vector<64x8xbf16>, vector<8x512xbf16>, vector<64x512xf32> -> vector<64x512xf32>
    %4 = vector.broadcast %2 : vector<64x1xf32> to vector<64x512xf32>
    %5 = arith.addf %3, %4 : vector<64x512xf32>
    %cst_5 = arith.constant 0.000000e+00 : f32
    %6 = vector.broadcast %cst_5 : f32 to vector<64x512xf32>
    %7 = arith.maximumf %5, %6 : vector<64x512xf32>
    %c0_6 = arith.constant 0 : index
    %c0_7 = arith.constant 0 : index
    %8 = vector.load %arg4[%c0_6, %c0_7] : memref<56x64xbf16, #tpu.memory_space<vmem>>, vector<56x64xbf16>
    %c0_8 = arith.constant 0 : index
    %c0_9 = arith.constant 0 : index
    %9 = vector.load %arg5[%c0_8, %c0_9] : memref<56x1xf32, #tpu.memory_space<vmem>>, vector<56x1xf32>
    %10 = arith.truncf %7 : vector<64x512xf32> to vector<64x512xbf16>
    %cst_10 = arith.constant dense<0.000000e+00> : vector<56x512xf32>
    %11 = tpu.matmul %8, %10, %cst_10 {dimension_numbers = #tpu.dot_dimension_numbers<[1], [0], [0], [1], [0, 0, 1, 1], [], []>} : vector<56x64xbf16>, vector<64x512xbf16>, vector<56x512xf32> -> vector<56x512xf32>
    %12 = vector.broadcast %9 : vector<56x1xf32> to vector<56x512xf32>
    %13 = arith.addf %11, %12 : vector<56x512xf32>
    %cst_11 = arith.constant 0.000000e+00 : f32
    %14 = vector.broadcast %cst_11 : f32 to vector<56x512xf32>
    %15 = arith.maximumf %13, %14 : vector<56x512xf32>
    %c0_12 = arith.constant 0 : index
    %c0_13 = arith.constant 0 : index
    %16 = vector.load %arg6[%c0_12, %c0_13] : memref<64x56xbf16, #tpu.memory_space<vmem>>, vector<64x56xbf16>
    %c0_14 = arith.constant 0 : index
    %c0_15 = arith.constant 0 : index
    %17 = vector.load %arg7[%c0_14, %c0_15] : memref<64x8xbf16, #tpu.memory_space<vmem>>, vector<64x8xbf16>
    %c0_16 = arith.constant 0 : index
    %c0_17 = arith.constant 0 : index
    %18 = vector.load %arg8[%c0_16, %c0_17] : memref<64x1xf32, #tpu.memory_space<vmem>>, vector<64x1xf32>
    %19 = arith.truncf %15 : vector<56x512xf32> to vector<56x512xbf16>
    %cst_18 = arith.constant dense<0.000000e+00> : vector<64x512xf32>
    %20 = tpu.matmul %16, %19, %cst_18 {dimension_numbers = #tpu.dot_dimension_numbers<[1], [0], [0], [1], [0, 0, 1, 1], [], []>} : vector<64x56xbf16>, vector<56x512xbf16>, vector<64x512xf32> -> vector<64x512xf32>
    %cst_19 = arith.constant dense<0.000000e+00> : vector<64x512xf32>
    %21 = tpu.matmul %17, %0, %cst_19 {dimension_numbers = #tpu.dot_dimension_numbers<[1], [0], [0], [1], [0, 0, 1, 1], [], []>} : vector<64x8xbf16>, vector<8x512xbf16>, vector<64x512xf32> -> vector<64x512xf32>
    %22 = arith.addf %20, %21 : vector<64x512xf32>
    %cst_20 = arith.constant 0.707106769 : f32
    %23 = vector.broadcast %cst_20 : f32 to vector<64x512xf32>
    %24 = arith.mulf %22, %23 : vector<64x512xf32>
    %25 = vector.broadcast %18 : vector<64x1xf32> to vector<64x512xf32>
    %26 = arith.addf %24, %25 : vector<64x512xf32>
    %cst_21 = arith.constant 0.000000e+00 : f32
    %27 = vector.broadcast %cst_21 : f32 to vector<64x512xf32>
    %28 = arith.maximumf %26, %27 : vector<64x512xf32>
    %c0_22 = arith.constant 0 : index
    %c0_23 = arith.constant 0 : index
    %29 = vector.load %arg9[%c0_22, %c0_23] : memref<4x64xf32, #tpu.memory_space<vmem>>, vector<4x64xf32>
    %c0_24 = arith.constant 0 : index
    %c0_25 = arith.constant 0 : index
    %30 = vector.load %arg10[%c0_24, %c0_25] : memref<4x1xf32, #tpu.memory_space<vmem>>, vector<4x1xf32>
    %cst_26 = arith.constant dense<0.000000e+00> : vector<4x512xf32>
    %31 = tpu.matmul %29, %28, %cst_26 {dimension_numbers = #tpu.dot_dimension_numbers<[1], [0], [0], [1], [0, 0, 1, 1], [], []>} : vector<4x64xf32>, vector<64x512xf32>, vector<4x512xf32> -> vector<4x512xf32>
    %32 = vector.broadcast %30 : vector<4x1xf32> to vector<4x512xf32>
    %33 = arith.addf %31, %32 : vector<4x512xf32>
    %c0_27 = arith.constant 0 : index
    %c0_28 = arith.constant 0 : index
    %34 = vector.load %arg11[%c0_27, %c0_28] : memref<4x512xf32, #tpu.memory_space<vmem>>, vector<4x512xf32>
    tpu.vector_store %arg11[%c0_27, %c0_28], %33 {strides = array<i32>} : memref<4x512xf32, #tpu.memory_space<vmem>>, vector<4x512xf32>,
    return
  }
  func.func @transform_0(%arg0: i32) -> (i32, i32) {
    %c0_i32 = arith.constant 0 : i32
    %c0_i32_0 = arith.constant 0 : i32
    return %c0_i32, %arg0 : i32, i32
  }
  func.func @transform_1(%arg0: i32) -> (i32, i32) {
    %c0_i32 = arith.constant 0 : i32
    %c0_i32_0 = arith.constant 0 : i32
    %c0_i32_1 = arith.constant 0 : i32
    return %c0_i32, %c0_i32_0 : i32, i32
  }
  func.func @transform_2(%arg0: i32) -> (i32, i32) {
    %c0_i32 = arith.constant 0 : i32
    %c0_i32_0 = arith.constant 0 : i32
    %c0_i32_1 = arith.constant 0 : i32
    return %c0_i32, %c0_i32_0 : i32, i32
  }
  func.func @transform_3(%arg0: i32) -> (i32, i32) {
    %c0_i32 = arith.constant 0 : i32
    %c0_i32_0 = arith.constant 0 : i32
    %c0_i32_1 = arith.constant 0 : i32
    return %c0_i32, %c0_i32_0 : i32, i32
  }
  func.func @transform_4(%arg0: i32) -> (i32, i32) {
    %c0_i32 = arith.constant 0 : i32
    %c0_i32_0 = arith.constant 0 : i32
    %c0_i32_1 = arith.constant 0 : i32
    return %c0_i32, %c0_i32_0 : i32, i32
  }
  func.func @transform_5(%arg0: i32) -> (i32, i32) {
    %c0_i32 = arith.constant 0 : i32
    %c0_i32_0 = arith.constant 0 : i32
    %c0_i32_1 = arith.constant 0 : i32
    return %c0_i32, %c0_i32_0 : i32, i32
  }
  func.func @transform_6(%arg0: i32) -> (i32, i32) {
    %c0_i32 = arith.constant 0 : i32
    %c0_i32_0 = arith.constant 0 : i32
    %c0_i32_1 = arith.constant 0 : i32
    return %c0_i32, %c0_i32_0 : i32, i32
  }
  func.func @transform_7(%arg0: i32) -> (i32, i32) {
    %c0_i32 = arith.constant 0 : i32
    %c0_i32_0 = arith.constant 0 : i32
    %c0_i32_1 = arith.constant 0 : i32
    return %c0_i32, %c0_i32_0 : i32, i32
  }
  func.func @transform_8(%arg0: i32) -> (i32, i32) {
    %c0_i32 = arith.constant 0 : i32
    %c0_i32_0 = arith.constant 0 : i32
    %c0_i32_1 = arith.constant 0 : i32
    return %c0_i32, %c0_i32_0 : i32, i32
  }
  func.func @transform_9(%arg0: i32) -> (i32, i32) {
    %c0_i32 = arith.constant 0 : i32
    %c0_i32_0 = arith.constant 0 : i32
    %c0_i32_1 = arith.constant 0 : i32
    return %c0_i32, %c0_i32_0 : i32, i32
  }
  func.func @transform_10(%arg0: i32) -> (i32, i32) {
    %c0_i32 = arith.constant 0 : i32
    %c0_i32_0 = arith.constant 0 : i32
    return %c0_i32, %arg0 : i32, i32
  }
}

</mosaic_0001>

<bundles_post_ra>
// kernel: tpu_custom_call.1
= control target key start
LH: loop header
LB: loop body
LE: loop exit
PB: predicated region body
PF: predicated region fallthrough
CT: control target
= control target key end

     0   :  { %15 = vsyncpa [#allocation3], 0  ;;  %s2491_s0 = inlined_call_operand.vmem [shape: bf16[8,2048], index: 0, kind: input, shape index: {}]   ;;  %s2492_s1 = inlined_call_operand.vmem [shape: bf16[64,8], index: 1, kind: input, shape index: {}]   ;;  %s2493_s2 = inlined_call_operand.vmem [shape: f32[64,1], index: 2, kind: input, shape index: {}]   ;;  %s2494_s3 = inlined_call_operand.vmem [shape: bf16[56,64], index: 3, kind: input, shape index: {}]   ;;  %s2495_s4 = inlined_call_operand.vmem [shape: f32[56,1], index: 4, kind: input, shape index: {}]   ;;  %s2496_s5 = inlined_call_operand.vmem [shape: bf16[64,56], index: 5, kind: input, shape index: {}]   ;;  %s2497_s6 = inlined_call_operand.vmem [shape: bf16[64,8], index: 6, kind: input, shape index: {}]   ;;  %s2498_s7 = inlined_call_operand.vmem [shape: f32[64,1], index: 7, kind: input, shape index: {}]   ;;  %s2499_s8 = inlined_call_operand.vmem [shape: f32[4,64], index: 8, kind: input, shape index: {}]   ;;  %s2500_s9 = inlined_call_operand.vmem [shape: f32[4,1], index: 9, kind: input, shape index: {}]   ;;  %s2501_s10 = inlined_call_operand.hbm [shape: f32[4,2048], index: 10, kind: output, shape index: {}]  }
   0x1   :  { %17 = vsyncpa [#allocation3 + $0x1], 0  ;;  %s1957_s13 = smov 0   ;;  %s1959_s14 = smov 0  }
   0x2   :  { %s1961_s15 = smov 0   ;;  %s1963_s16 = smov 0  }
   0x3 LB: > { %s1978_s17 = sadd.s32 4294967295, %s1897_s16   ;;  %s1701_s18 = sadd.s32 4294967294, %s1897_s16   ;;  %s1897_s16 = sphi %s1963_s16, %s2515_s16   ;;  %s1893_s15 = sphi %s1961_s15, %s2514_s15   ;;  %s1889_s14 = sphi %s1959_s14, %s2513_s14   ;;  %s1885_s13 = sphi %s1957_s13, %s2512_s13  }
   0x4   : > { %s1982_s19 = sadd.s32 1, %s1897_s16   ;;  %s245_s20 = sadd.s32 1, %s1893_s15 }
   0x5   : > { %s242_s21 = ssub.s32 %s1897_s16, %s1982_s19  ;;  %p255_p0 = scmp.ne.s32.totalorder %s1893_s15, %s1889_s14 }
   0x6   : > { %p243_p1 = scmp.eq.s32.totalorder %s242_s21, 0  ;;  %p256_p2 = scmp.eq.s32.totalorder %s1978_s17, 3 }
   0x7   : > { %p261_p3 = scmp.ne.s32.totalorder %s1889_s14, %s1885_s13  ;;  %p262_p4 = scmp.eq.s32.totalorder %s1701_s18, 3 }
   0x8   : > { %s1993_s22 = scalar_select %p243_p1, %s1893_s15, %s245_s20  }
   0x9   : > { %p1995_p5 = por %p256_p2, %p255_p0  ;;  %p1999_p6 = por %p262_p4, %p261_p3 }
   0xa   : > { %p1704_p7 = scmp.ge.s32.totalorder %s1897_s16, 1  ;;  %p316_p8 = scmp.lt.s32.totalorder %s1897_s16, 5 }
   0xc   : > { %p317_p9 = pnand %p1704_p7, %p316_p8 }
   0xe   : > { %320 = sbr.rel (%p317_p9) target bundleno = 977 (0x3d1), region = 60 }
  0x13   : > { %s1706_s25 = sshll.u32 %s1978_s17, 2  ;;  %v1899_v0 = vmov 0   ;;  %v378_v1 = vld [vmem:[%s2493_s2 + $0x30] sm:$0xff]  ;;  %v376_v2 = vld [vmem:[%s2493_s2 + $0x20] sm:$0xff]  ;;  %v379_v3 = vld [vmem:[%s2493_s2 + $0x38] sm:$0xff]  ;;  %vm463_vm0 = vcmask 1043456  }
  0x14   : > { %p355_p10 = scmp.lt.s32.totalorder %s1706_s25, 15  ;;  %508 = vmatprep.mubr.bf16.mxu0 %v1899_v0  ;;  %581 = vmatprep.mubr.bf16.mxu1 %v1899_v0  ;;  %v377_v10 = vld [vmem:[%s2493_s2 + $0x28] sm:$0xff]  ;;  %v1821_v13 = vld [vmem:[%s2492_s1] sm:$0xff]   ;;  %v374_v14 = vld [vmem:[%s2493_s2 + $0x10] sm:$0xff]  ;;  %vm450_vm1 = vcmask 64512   ;;  %vm737_vm2 = vcmask 523264  }
  0x15   : > { %1815 = vset.pattern.permute.xlu0 %v1899_v0  ;;  %1816 = vset.pattern.permute.xlu1 %v1899_v0  ;;  %v375_v15 = vld [vmem:[%s2493_s2 + $0x18] sm:$0xff]  ;;  %v372_v16 = vld [vmem:[%s2493_s2] sm:$0xff]  ;;  %v373_v17 = vld [vmem:[%s2493_s2 + $0x8] sm:$0xff]  ;;  %vm1158_vm3 = vcmask 457728   ;;  %s351_s21 = sand.u32 1, %s1889_s14   ;;  %s1773_s26 = sshll.u32 %s1978_s17, 8 }
  0x16   : > { %s2517_s25 = smov (!%p355_p10, %s1706_s25), 15  ;;  %412 = vperm.xlu0 %1815, %v378_v1   ;;  %402 = vperm.xlu1 %1816, %v376_v2   ;;  %v1822_v18 = vld [vmem:[%s2492_s1 + $0x8] sm:$0xff]   ;;  %v667_v19 = vld [vmem:[%s2495_s4 + $0x30] sm:$0xff]  ;;  %v665_v20 = vld [vmem:[%s2495_s4 + $0x20] sm:$0xff]  ;;  %s2456_s11 = scalar_lea.hbm %s2501_s10, %s1773_s26 }
  0x17   : > { %s1707_s28 = sshll.u32 %s2517_s25, 2  ;;  %v666_v21 = vld [vmem:[%s2495_s4 + $0x28] sm:$0xff]  ;;  %v663_v22 = vld [vmem:[%s2495_s4 + $0x10] sm:$0xff]  ;;  %v664_v24 = vld [vmem:[%s2495_s4 + $0x18] sm:$0xff]  ;;  %s1705_s25 = sshll.u32 %s351_s21, 4 }
  0x18   : > { %s358_s18 = scalar_lea.vmem %s2491_s0, %s1707_s28  ;;  %v1823_v23 = vld [vmem:[%s2492_s1 + $0x10] sm:$0xff]   ;;  %v661_v25 = vld [vmem:[%s2495_s4] sm:$0xff]  ;;  %v662_v26 = vld [vmem:[%s2495_s4 + $0x8] sm:$0xff]  ;;  %s353_s27 = scalar_lea.vmem [#allocation2], %s1705_s25 }
  0x19   : > { %v362_v4 = vld [vmem:[%s358_s18] sm:$0xff]  ;;  %v363_v5 = vld [vmem:[%s358_s18 + $0x8] sm:$0xff]  ;;  %v943_v27 = vld [vmem:[%s2498_s7 + $0x38] sm:$0xff]  ;;  %s1642_s28 = sshll.u32 %s353_s27, 4  ;;  %s1628_s12 = scalar_lea.sflag [#allocation3], %s351_s21  ;;  %s1643_s28 = int_to_ptr.vmem [resolvable:$true] %s1642_s28 }
  0x1a   : > { %v2022_v6 = vcombine.high %v362_v4, %v362_v4  ;;  %v2024_v7 = vcombine.high %v363_v5, %v363_v5  ;;  %v1712_v8 = vcombine.low %v362_v4, %v362_v4  ;;  %v1714_v9 = vcombine.low %v363_v5, %v363_v5  ;;  %417 = vperm.xlu0 %1815, %v379_v3   ;;  %v1824_v28 = vld [vmem:[%s2492_s1 + $0x18] sm:$0xff]   ;;  %v942_v29 = vld [vmem:[%s2498_s7 + $0x30] sm:$0xff]  ;;  %v941_v30 = vld [vmem:[%s2498_s7 + $0x28] sm:$0xff]  ;;  %s1837_s18 = scalar_lea.vmem %s1643_s28, 256  ;;  %s1901_s17 = smov [#allocation2]  }
  0x1b   : > { %407 = vperm.xlu1 %1816, %v377_v10   ;;  %v940_v31 = vld [vmem:[%s2498_s7 + $0x20] sm:$0xff]  ;;  %v939_v32 = vld [vmem:[%s2498_s7 + $0x18] sm:$0xff]  ;;  %v938_v33 = vld [vmem:[%s2498_s7 + $0x10] sm:$0xff]  ;;  %p1838_p11 = scmp.ne.s32.totalorder %s1643_s28, %s1837_s18  ;;  %s1841_s20 = sshll.u32 %s1901_s17, 4  ;;  %s1842_s20 = int_to_ptr.vmem [resolvable:$false] %s1841_s20 }
  0x1c   : > { %1716 = vmatprep.subr.msk.bf16.mxu0 %vm463_vm0, %v2022_v6  ;;  %1721 = vmatprep.subr.msk.bf16.mxu1 %vm463_vm0, %v2024_v7  ;;  %v2034_v11 = vsel %vm463_vm0, %v1712_v8, 0  ;;  %v2037_v12 = vsel %vm463_vm0, %v1714_v9, 0  ;;  %v937_v34 = vld [vmem:[%s2498_s7 + $0x8] sm:$0xff]  ;;  %v936_v35 = vld [vmem:[%s2498_s7] sm:$0xff]  ;;  %s1843_s25 = scalar_lea.vmem %s1842_s20, 512  ;;  %p1844_p0 = scmp.lt.s32.totalorder %s1643_s28, %s1842_s20 }
  0x1d   : > { %491 = vmatpush1.bf16.msra.mxu0 %v2034_v11  ;;  %564 = vmatpush1.bf16.msra.mxu1 %v2037_v12  ;;  %v1466_v36 = vld [vmem:[%s2500_s9] sm:$0xf]  ;;  %p1839_p12 = pnand %p1838_p11, %p1995_p5  ;;  %p1845_p1 = scmp.lt.s32.totalorder %s1843_s25, %s1837_s18 }
  0x1e   : > { %392 = vperm.xlu0 %1815, %v374_v14  }
  0x1f   : > { %397 = vperm.xlu1 %1816, %v375_v15   ;;  %p1840_p13 = pneg %p1839_p12  ;;  %p1846_p2 = por %p1845_p1, %p1844_p0 }
  0x20   : > { %1717 = vmatmul.mubr.msk.bf16.vlgmr.msra.gmra.mxu0 %vm450_vm1, %v1821_v13  ;;  %1722 = vmatmul.mubr.msk.bf16.vlgmr.msra.gmra.mxu1 %vm450_vm1, %v1821_v13 }
  0x21   : > { %518 = vmatprep.mubr.bf16.mxu0 %v1899_v0  ;;  %591 = vmatprep.mubr.bf16.mxu1 %v1899_v0  ;;  %p1847_p3 = pnand %p1846_p2, %p1840_p13 }
  0x22   : > { %382 = vperm.xlu0 %1815, %v372_v16  }
  0x23   : > { %387 = vperm.xlu1 %1816, %v373_v17  }
  0x26   : > { %716 = vperm.xlu0 %1815, %v667_v19  }
  0x27   : > { %706 = vperm.xlu1 %1816, %v665_v20  }
  0x28   : > { %1718 = vmatmul.mubr.msk.bf16.gmra.mxu0 %vm450_vm1, %v1822_v18  ;;  %1723 = vmatmul.mubr.msk.bf16.gmra.mxu1 %vm450_vm1, %v1822_v18 }
  0x29   : > { %528 = vmatprep.mubr.bf16.mxu0 %v1899_v0  ;;  %601 = vmatprep.mubr.bf16.mxu1 %v1899_v0 }
  0x2a   : > { %711 = vperm.xlu0 %1815, %v666_v21  }
  0x2b   : > { %696 = vperm.xlu1 %1816, %v663_v22  }
  0x2e   : > { %701 = vperm.xlu0 %1815, %v664_v24  }
  0x2f   : > { %686 = vperm.xlu1 %1816, %v661_v25  }
  0x30   : > { %1719 = vmatmul.mubr.msk.bf16.gmra.mxu0 %vm450_vm1, %v1823_v23  ;;  %1724 = vmatmul.mubr.msk.bf16.gmra.mxu1 %vm450_vm1, %v1823_v23 }
  0x31   : > { %538 = vmatprep.mubr.bf16.mxu0 %v1899_v0  ;;  %611 = vmatprep.mubr.bf16.mxu1 %v1899_v0 }
  0x32   : > { %691 = vperm.xlu0 %1815, %v662_v26  }
  0x33   : > { %1398 = vperm.xlu1 %1816, %v943_v27  }
  0x36   : > { %1393 = vperm.xlu0 %1815, %v942_v29  }
  0x37   : > { %1388 = vperm.xlu1 %1816, %v941_v30  }
  0x38   : > { %1720 = vmatmul.mubr.msk.bf16.gmra.mxu0 %vm450_vm1, %v1824_v28  ;;  %1725 = vmatmul.mubr.msk.bf16.gmra.mxu1 %vm450_vm1, %v1824_v28 }
  0x39   : > { %782 = vmatprep.mubr.bf16.mxu0 %v1899_v0  ;;  %853 = vmatprep.mubr.bf16.mxu1 %v1899_v0 }
  0x3a   : > { %1383 = vperm.xlu0 %1815, %v940_v31  }
  0x3b   : > { %1378 = vperm.xlu1 %1816, %v939_v32  }
  0x3e   : > { %1373 = vperm.xlu0 %1815, %v938_v33  }
  0x3f   : > { %1368 = vperm.xlu1 %1816, %v937_v34  }
  0x42   : > { %1363 = vperm.xlu0 %1815, %v936_v35  }
  0x43   : > { %1469 = vperm.xlu1 %1816, %v1466_v36  }
  0x91   : > { %v413_v45 = vpop.permute.xlu0 %412  ;;  %v2137_v46 = vpop.permute.xlu1 %402 }
  0x95   : > { %v418_v53 = vpop.permute.xlu0 %417 }
  0x96   : > { %v408_v54 = vpop.permute.xlu1 %407 }
  0x99   : > { %v2143_v61 = vpop.permute.xlu0 %392 }
  0x9a   : > { %v398_v62 = vpop.permute.xlu1 %397 }
  0x9d   : > { %v2145_v8 = vpop.permute.xlu0 %382 }
  0x9e   : > { %v2147_v9 = vpop.permute.xlu1 %387 }
  0xe0   : > { %v2129_v37 = vpop.f32.mrf.mxu0  ;;  %v2131_v38 = vpop.f32.mrf.mxu1 }
  0xe2   : > { %v512_v39 = vpop.f32.mrf.mxu0  ;;  %v585_v40 = vpop.f32.mrf.mxu1 }
  0xe3   : > { %v2150_v10 = vadd.f32 %v512_v39, %v2145_v8  ;;  %v2153_v13 = vadd.f32 %v585_v40, %v2145_v8 }
  0xe4   : > { %v2133_v41 = vpop.f32.mrf.mxu0  ;;  %v2135_v42 = vpop.f32.mrf.mxu1 }
  0xe6   : > { %v516_v43 = vpop.f32.mrf.mxu0  ;;  %v589_v44 = vpop.f32.mrf.mxu1 }
  0xe7   : > { %v2156_v14 = vadd.f32 %v516_v43, %v2147_v9  ;;  %v2159_v15 = vadd.f32 %v589_v44, %v2147_v9 }
  0xe8   : > { %v2139_v47 = vpop.f32.mrf.mxu0  ;;  %v2141_v48 = vpop.f32.mrf.mxu1 }
  0xea   : > { %v522_v49 = vpop.f32.mrf.mxu0  ;;  %v595_v50 = vpop.f32.mrf.mxu1 }
  0xeb   : > { %v2162_v18 = vadd.f32 %v522_v49, %v2143_v61  ;;  %v2165_v19 = vadd.f32 %v595_v50, %v2143_v61 }
  0xec   : > { %v524_v51 = vpop.f32.mrf.mxu0  ;;  %v597_v52 = vpop.f32.mrf.mxu1 }
  0xed   : > { %v2167_v20 = vadd.f32 %v524_v51, %v398_v62  ;;  %v2169_v21 = vadd.f32 %v597_v52, %v398_v62 }
  0xee   : > { %v526_v55 = vpop.f32.mrf.mxu0  ;;  %v599_v56 = vpop.f32.mrf.mxu1 }
  0xef   : > { %v2171_v22 = vadd.f32 %v526_v55, %v398_v62  ;;  %v2173_v23 = vadd.f32 %v599_v56, %v398_v62 }
  0xf0   : > { %v530_v57 = vpop.f32.mrf.mxu0  ;;  %v603_v58 = vpop.f32.mrf.mxu1 }
  0xf2   : > { %v532_v59 = vpop.f32.mrf.mxu0  ;;  %v605_v60 = vpop.f32.mrf.mxu1 }
  0xf3   : > { %v533_v32 = vadd.f32 %v532_v59, %v2137_v46  ;;  %v606_v33 = vadd.f32 %v605_v60, %v2137_v46  ;;  %v531_v59 = vadd.f32 %v530_v57, %v2137_v46  ;;  %v604_v60 = vadd.f32 %v603_v58, %v2137_v46 }
  0xf4   : > { %v534_v63 = vpop.f32.mrf.mxu0  ;;  %v607_v1 = vpop.f32.mrf.mxu1  ;;  %v521_v46 = vadd.f32 %v2139_v47, %v2143_v61  ;;  %v594_v57 = vadd.f32 %v2141_v48, %v2143_v61  ;;  %v634_v47 = vmax.f32 %v2167_v20, 0.0  ;;  %v636_v48 = vmax.f32 %v2169_v21, 0.0 }
  0xf5   : > { %v535_v40 = vadd.f32 %v534_v63, %v408_v54  ;;  %v608_v43 = vadd.f32 %v607_v1, %v408_v54  ;;  %v638_v58 = vmax.f32 %v531_v59, 0.0  ;;  %v623_v20 = vmax.f32 %v2150_v10, 0.0  ;;  %v1825_v10 = vld [vmem:[%s2494_s3] sm:$0xff]  }
  0xf6   : > { %v536_v2 = vpop.f32.mrf.mxu0  ;;  %v609_v3 = vpop.f32.mrf.mxu1  ;;  %v625_v21 = vmax.f32 %v2153_v13, 0.0  ;;  %v1826_v13 = vld [vmem:[%s2494_s3 + $0x8] sm:$0xff]  }
  0xf7   : > { %v537_v24 = vadd.f32 %v536_v2, %v408_v54  ;;  %v610_v25 = vadd.f32 %v609_v3, %v408_v54  ;;  %v642_v1 = vmax.f32 %v535_v40, 0.0 }
  0xf8   : > { %v540_v4 = vpop.f32.mrf.mxu0  ;;  %v613_v5 = vpop.f32.mrf.mxu1 }
  0xf9   : > { %v541_v34 = vadd.f32 %v540_v4, %v413_v45  ;;  %v614_v35 = vadd.f32 %v613_v5, %v413_v45  ;;  %v643_v50 = vmax.f32 %v537_v24, 0.0  ;;  %v645_v51 = vmax.f32 %v610_v25, 0.0 }
  0xfa   : > { %v542_v16 = vpop.f32.mrf.mxu0  ;;  %v615_v17 = vpop.f32.mrf.mxu1  ;;  %v639_v5 = vmax.f32 %v533_v32, 0.0  ;;  %v635_v25 = vmax.f32 %v2171_v22, 0.0  ;;  %v588_v22 = vadd.f32 %v2135_v42, %v2147_v9  ;;  %v676_v61 = vpack.c.bf16 %v642_v1, %v638_v58 }
  0xfb   : > { %v543_v28 = vadd.f32 %v542_v16, %v413_v45  ;;  %v616_v29 = vadd.f32 %v615_v17, %v413_v45  ;;  %v646_v4 = vmax.f32 %v541_v34, 0.0  ;;  %v648_v45 = vmax.f32 %v614_v35, 0.0 }
  0xfc   : > { %v544_v26 = vpop.f32.mrf.mxu0  ;;  %v617_v27 = vpop.f32.mrf.mxu1  ;;  %v641_v16 = vmax.f32 %v606_v33, 0.0  ;;  %v627_v33 = vmax.f32 %v2156_v14, 0.0  ;;  %v629_v34 = vmax.f32 %v2159_v15, 0.0  ;;  %v511_v42 = vadd.f32 %v2129_v37, %v2145_v8 }
  0xfd   : > { %v545_v30 = vadd.f32 %v544_v26, %v418_v53  ;;  %v618_v31 = vadd.f32 %v617_v27, %v418_v53  ;;  %v647_v56 = vmax.f32 %v543_v28, 0.0  ;;  %v649_v62 = vmax.f32 %v616_v29, 0.0 }
  0xfe   : > { %v546_v36 = vpop.f32.mrf.mxu0  ;;  %v619_v39 = vpop.f32.mrf.mxu1  ;;  %v637_v26 = vmax.f32 %v2173_v23, 0.0  ;;  %v677_v27 = vpack.c.bf16 %v643_v50, %v639_v5  ;;  %v679_v28 = vpack.c.bf16 %v645_v51, %v641_v16  ;;  %v640_v29 = vmax.f32 %v604_v60, 0.0  ;;  %v1832_v50 = vld [vmem:[%s2497_s6 + $0x18] sm:$0xff]  }
  0xff   : > { %v547_v44 = vadd.f32 %v546_v36, %v418_v53  ;;  %v620_v49 = vadd.f32 %v619_v39, %v418_v53  ;;  %v650_v52 = vmax.f32 %v545_v30, 0.0  ;;  %v652_v55 = vmax.f32 %v618_v31, 0.0  ;;  %v707_v5 = vpop.permute.xlu1 %706 }
 0x100   : > { %v644_v53 = vmax.f32 %v608_v43, 0.0  ;;  %v515_v30 = vadd.f32 %v2133_v41, %v2147_v9  ;;  %v631_v23 = vmax.f32 %v2162_v18, 0.0  ;;  %v633_v31 = vmax.f32 %v2165_v19, 0.0 }
 0x101   : > { %v651_v2 = vmax.f32 %v547_v44, 0.0  ;;  %v653_v3 = vmax.f32 %v620_v49, 0.0  ;;  %v680_v17 = vpack.c.bf16 %v650_v52, %v646_v4  ;;  %v682_v24 = vpack.c.bf16 %v652_v55, %v648_v45  ;;  %v1831_v49 = vld [vmem:[%s2497_s6 + $0x10] sm:$0xff]  }
 0x102   : > { %v678_v32 = vpack.c.bf16 %v644_v53, %v640_v29  ;;  %v673_v41 = vpack.c.bf16 %v635_v25, %v631_v23  ;;  %v675_v35 = vpack.c.bf16 %v637_v26, %v633_v31  ;;  %v584_v9 = vadd.f32 %v2131_v38, %v2145_v8 }
 0x103   : > { %v681_v63 = vpack.c.bf16 %v651_v2, %v647_v56  ;;  %v683_v54 = vpack.c.bf16 %v653_v3, %v649_v62  ;;  %v630_v18 = vmax.f32 %v521_v46, 0.0  ;;  %v632_v19 = vmax.f32 %v594_v57, 0.0  ;;  %v717_v3 = vpop.permute.xlu0 %716  ;;  %v2275_v25 = vpop.permute.xlu1 %696 }
 0x104   : > { %v626_v14 = vmax.f32 %v515_v30, 0.0  ;;  %v628_v15 = vmax.f32 %v588_v22, 0.0  ;;  %v669_v40 = vpack.c.bf16 %v627_v33, %v623_v20  ;;  %v671_v43 = vpack.c.bf16 %v629_v34, %v625_v21 }
 0x105   : > { %758 = vmatprep.subr.bf16.mxu0 %v681_v63  ;;  %829 = vmatprep.subr.bf16.mxu1 %v683_v54  ;;  %v672_v36 = vpack.c.bf16 %v634_v47, %v630_v18  ;;  %v674_v39 = vpack.c.bf16 %v636_v48, %v632_v19  ;;  %v622_v37 = vmax.f32 %v511_v42, 0.0  ;;  %v624_v44 = vmax.f32 %v584_v9, 0.0 }
 0x106   : > { %759 = vmatpush1.bf16.msra.mxu0 %v680_v17  ;;  %830 = vmatpush1.bf16.msra.mxu1 %v682_v24 }
 0x107   : > { %760 = vmatprep.subr.bf16.mxu0 %v677_v27  ;;  %831 = vmatprep.subr.bf16.mxu1 %v679_v28  ;;  %v668_v38 = vpack.c.bf16 %v626_v14, %v622_v37  ;;  %v670_v8 = vpack.c.bf16 %v628_v15, %v624_v44  ;;  %v712_v54 = vpop.permute.xlu0 %711  ;;  %v2277_v30 = vpop.permute.xlu1 %686 }
 0x10a   : > { %761 = vmatpush1.bf16.msra.mxu0 %v676_v61  ;;  %832 = vmatpush1.bf16.msra.mxu1 %v678_v32 }
 0x10b   : > { %762 = vmatprep.subr.bf16.mxu0 %v673_v41  ;;  %833 = vmatprep.subr.bf16.mxu1 %v675_v35  ;;  %v702_v28 = vpop.permute.xlu0 %701 }
 0x10e   : > { %763 = vmatpush1.bf16.msra.mxu0 %v672_v36  ;;  %834 = vmatpush1.bf16.msra.mxu1 %v674_v39 }
 0x10f   : > { %764 = vmatprep.subr.bf16.mxu0 %v669_v40  ;;  %835 = vmatprep.subr.bf16.mxu1 %v671_v43  ;;  %v692_v31 = vpop.permute.xlu0 %691 }
 0x112   : > { %765 = vmatpush1.bf16.msra.mxu0 %v668_v38  ;;  %836 = vmatpush1.bf16.msra.mxu1 %v670_v8 }
 0x113   : > { %1742 = vmatprep.subr.msk.bf16.mxu0 %vm463_vm0, %v2022_v6  ;;  %1747 = vmatprep.subr.msk.bf16.mxu1 %vm463_vm0, %v2024_v7  ;;  %v1827_v6 = vld [vmem:[%s2494_s3 + $0x10] sm:$0xff]   ;;  %v1828_v7 = vld [vmem:[%s2494_s3 + $0x18] ss:$0 sps:$4 sm:$0xff]  }
 0x115   : > { %1730 = vmatmul.mubr.msk.bf16.vlgmr.msra.gmra.mxu0 %vm737_vm2, %v1825_v10  ;;  %1734 = vmatmul.mubr.msk.bf16.vlgmr.msra.gmra.mxu1 %vm737_vm2, %v1825_v10 }
 0x116   : > { %792 = vmatprep.mubr.bf16.mxu0 %v1899_v0  ;;  %863 = vmatprep.mubr.bf16.mxu1 %v1899_v0 }
 0x117   : > { %1007 = vmatpush1.bf16.msra.mxu0 %v2034_v11  ;;  %1080 = vmatpush1.bf16.msra.mxu1 %v2037_v12  ;;  %v1829_v11 = vld [vmem:[%s2497_s6] sm:$0xff]   ;;  %v1830_v12 = vld [vmem:[%s2497_s6 + $0x8] sm:$0xff]  }
 0x11d   : > { %1731 = vmatmul.mubr.msk.bf16.gmra.mxu0 %vm737_vm2, %v1826_v13  ;;  %1735 = vmatmul.mubr.msk.bf16.gmra.mxu1 %vm737_vm2, %v1826_v13 }
 0x11e   : > { %802 = vmatprep.mubr.bf16.mxu0 %v1899_v0  ;;  %873 = vmatprep.mubr.bf16.mxu1 %v1899_v0 }
 0x125   : > { %1732 = vmatmul.mubr.msk.bf16.gmra.mxu0 %vm737_vm2, %v1827_v6  ;;  %1736 = vmatmul.mubr.msk.bf16.gmra.mxu1 %vm737_vm2, %v1827_v6 }
 0x126   : > { %812 = vmatprep.mubr.bf16.mxu0 %v1899_v0  ;;  %883 = vmatprep.mubr.bf16.mxu1 %v1899_v0 }
 0x12d   : > { %1733 = vmatmul.mubr.msk.bf16.gmra.mxu0 %vm737_vm2, %v1828_v7  ;;  %1737 = vmatmul.mubr.msk.bf16.gmra.mxu1 %vm737_vm2, %v1828_v7 }
 0x12e   : > { %1024 = vmatprep.mubr.bf16.mxu0 %v1899_v0  ;;  %1097 = vmatprep.mubr.bf16.mxu1 %v1899_v0 }
 0x135   : > { %1743 = vmatmul.mubr.msk.bf16.vlgmr.msra.gmra.mxu0 %vm450_vm1, %v1829_v11  ;;  %1748 = vmatmul.mubr.msk.bf16.vlgmr.msra.gmra.mxu1 %vm450_vm1, %v1829_v11 }
 0x136   : > { %1034 = vmatprep.mubr.bf16.mxu0 %v1899_v0  ;;  %1107 = vmatprep.mubr.bf16.mxu1 %v1899_v0 }
 0x13d   : > { %1744 = vmatmul.mubr.msk.bf16.gmra.mxu0 %vm450_vm1, %v1830_v12  ;;  %1749 = vmatmul.mubr.msk.bf16.gmra.mxu1 %vm450_vm1, %v1830_v12 }
 0x13e   : > { %1044 = vmatprep.mubr.bf16.mxu0 %v1899_v0  ;;  %1117 = vmatprep.mubr.bf16.mxu1 %v1899_v0 }
 0x145   : > { %1745 = vmatmul.mubr.msk.bf16.gmra.mxu0 %vm450_vm1, %v1831_v49  ;;  %1750 = vmatmul.mubr.msk.bf16.gmra.mxu1 %vm450_vm1, %v1831_v49 }
 0x146   : > { %1054 = vmatprep.mubr.bf16.mxu0 %v1899_v0  ;;  %1127 = vmatprep.mubr.bf16.mxu1 %v1899_v0 }
 0x14d   : > { %1746 = vmatmul.mubr.msk.bf16.gmra.mxu0 %vm450_vm1, %v1832_v50  ;;  %1751 = vmatmul.mubr.msk.bf16.gmra.mxu1 %vm450_vm1, %v1832_v50 }
 0x14e   : > { %1215 = vmatprep.mubr.bf16.mxu0 %v1899_v0  ;;  %1288 = vmatprep.mubr.bf16.mxu1 %v1899_v0 }
 0x1d5   : > { %v2263_v51 = vpop.f32.mrf.mxu0  ;;  %v2265_v52 = vpop.f32.mrf.mxu1 }
 0x1d7   : > { %v786_v55 = vpop.f32.mrf.mxu0  ;;  %v857_v56 = vpop.f32.mrf.mxu1 }
 0x1d8   : > { %v2280_v47 = vadd.f32 %v786_v55, %v2277_v30  ;;  %v2283_v48 = vadd.f32 %v857_v56, %v2277_v30 }
 0x1d9   : > { %v2267_v62 = vpop.f32.mrf.mxu0  ;;  %v2269_v2 = vpop.f32.mrf.mxu1 }
 0x1db   : > { %v790_v59 = vpop.f32.mrf.mxu0  ;;  %v861_v60 = vpop.f32.mrf.mxu1 }
 0x1dc   : > { %v2285_v61 = vadd.f32 %v790_v59, %v692_v31  ;;  %v2287_v32 = vadd.f32 %v861_v60, %v692_v31 }
 0x1dd   : > { %v2271_v4 = vpop.f32.mrf.mxu0  ;;  %v2273_v45 = vpop.f32.mrf.mxu1 }
 0x1df   : > { %v796_v16 = vpop.f32.mrf.mxu0  ;;  %v867_v63 = vpop.f32.mrf.mxu1 }
 0x1e0   : > { %v2290_v33 = vadd.f32 %v796_v16, %v2275_v25  ;;  %v2293_v34 = vadd.f32 %v867_v63, %v2275_v25 }
 0x1e1   : > { %v798_v1 = vpop.f32.mrf.mxu0  ;;  %v869_v53 = vpop.f32.mrf.mxu1 }
 0x1e2   : > { %v2295_v42 = vadd.f32 %v798_v1, %v702_v28  ;;  %v2297_v9 = vadd.f32 %v869_v53, %v702_v28 }
 0x1e3   : > { %v800_v17 = vpop.f32.mrf.mxu0  ;;  %v871_v24 = vpop.f32.mrf.mxu1 }
 0x1e4   : > { %v801_v20 = vadd.f32 %v800_v17, %v702_v28  ;;  %v872_v21 = vadd.f32 %v871_v24, %v702_v28 }
 0x1e5   : > { %v804_v26 = vpop.f32.mrf.mxu0  ;;  %v875_v27 = vpop.f32.mrf.mxu1 }
 0x1e6   : > { %v805_v55 = vadd.f32 %v804_v26, %v707_v5  ;;  %v876_v56 = vadd.f32 %v875_v27, %v707_v5  ;;  %v905_v24 = vmax.f32 %v801_v20, 0.0  ;;  %v795_v27 = vadd.f32 %v2271_v4, %v2275_v25 }
 0x1e7   : > { %v806_v46 = vpop.f32.mrf.mxu0  ;;  %v877_v57 = vpop.f32.mrf.mxu1  ;;  %v904_v20 = vmax.f32 %v2295_v42, 0.0  ;;  %v906_v4 = vmax.f32 %v2297_v9, 0.0  ;;  %v893_v42 = vmax.f32 %v2280_v47, 0.0  ;;  %v895_v9 = vmax.f32 %v2283_v48, 0.0  ;;  %v1833_v47 = vld [vmem:[%s2496_s5] sm:$0xff]   ;;  %v1834_v48 = vld [vmem:[%s2496_s5 + $0x8] sm:$0xff]  }
 0x1e8   : > { %v807_v40 = vadd.f32 %v806_v46, %v707_v5  ;;  %v878_v43 = vadd.f32 %v877_v57, %v707_v5 }
 0x1e9   : > { %v808_v58 = vpop.f32.mrf.mxu0  ;;  %v879_v29 = vpop.f32.mrf.mxu1 }
 0x1ea   : > { %v809_v38 = vadd.f32 %v808_v58, %v712_v54  ;;  %v880_v8 = vadd.f32 %v879_v29, %v712_v54  ;;  %v909_v1 = vmax.f32 %v807_v40, 0.0  ;;  %v911_v53 = vmax.f32 %v878_v43, 0.0 }
 0x1eb   : > { %v810_v22 = vpop.f32.mrf.mxu0  ;;  %v881_v23 = vpop.f32.mrf.mxu1  ;;  %v866_v29 = vadd.f32 %v2273_v45, %v2275_v25  ;;  %v897_v25 = vmax.f32 %v2285_v61, 0.0 }
 0x1ec   : > { %v811_v18 = vadd.f32 %v810_v22, %v712_v54  ;;  %v882_v19 = vadd.f32 %v881_v23, %v712_v54  ;;  %v907_v54 = vmax.f32 %v872_v21, 0.0  ;;  %v912_v28 = vmax.f32 %v809_v38, 0.0  ;;  %v1836_v38 = vld [vmem:[%s2496_s5 + $0x18] sm:$0xff]  }
 0x1ed   : > { %v814_v41 = vpop.f32.mrf.mxu0  ;;  %v885_v35 = vpop.f32.mrf.mxu1  ;;  %v914_v46 = vmax.f32 %v880_v8, 0.0  ;;  %v908_v22 = vmax.f32 %v805_v55, 0.0  ;;  %v910_v23 = vmax.f32 %v876_v56, 0.0  ;;  %v945_v40 = vpack.c.bf16 %v897_v25, %v893_v42 }
 0x1ee   : > { %v815_v14 = vadd.f32 %v814_v41, %v717_v3  ;;  %v886_v15 = vadd.f32 %v885_v35, %v717_v3  ;;  %v913_v11 = vmax.f32 %v811_v18, 0.0  ;;  %v915_v12 = vmax.f32 %v882_v19, 0.0 }
 0x1ef   : > { %v816_v36 = vpop.f32.mrf.mxu0  ;;  %v887_v39 = vpop.f32.mrf.mxu1  ;;  %v789_v41 = vadd.f32 %v2267_v62, %v692_v31  ;;  %v860_v35 = vadd.f32 %v2269_v2, %v692_v31  ;;  %v901_v18 = vmax.f32 %v2290_v33, 0.0  ;;  %v903_v19 = vmax.f32 %v2293_v34, 0.0 }
 0x1f0   : > { %v817_v37 = vadd.f32 %v816_v36, %v717_v3  ;;  %v888_v44 = vadd.f32 %v887_v39, %v717_v3  ;;  %v916_v10 = vmax.f32 %v815_v14, 0.0  ;;  %v918_v13 = vmax.f32 %v886_v15, 0.0 }
 0x1f1   : > { %v818_v6 = vpop.f32.mrf.mxu0  ;;  %v889_v7 = vpop.f32.mrf.mxu1  ;;  %v953_v57 = vpack.c.bf16 %v913_v11, %v909_v1  ;;  %v955_v58 = vpack.c.bf16 %v915_v12, %v911_v53  ;;  %v952_v21 = vpack.c.bf16 %v912_v28, %v908_v22  ;;  %v954_v45 = vpack.c.bf16 %v914_v46, %v910_v23 }
 0x1f2   : > { %v917_v49 = vmax.f32 %v817_v37, 0.0  ;;  %v919_v50 = vmax.f32 %v888_v44, 0.0  ;;  %v956_v59 = vpack.c.bf16 %v916_v10, %v916_v10  ;;  %v958_v60 = vpack.c.bf16 %v918_v13, %v918_v13  ;;  %v1835_v44 = vld [vmem:[%s2496_s5 + $0x10] sm:$0xff]  }
 0x1f3   : > { %v819_v16 = vpop.f32.mrf.mxu0  ;;  %v890_v63 = vpop.f32.mrf.mxu1  ;;  %v899_v14 = vmax.f32 %v2287_v32, 0.0  ;;  %v949_v15 = vpack.c.bf16 %v905_v24, %v901_v18  ;;  %v951_v62 = vpack.c.bf16 %v907_v54, %v903_v19  ;;  %v785_v2 = vadd.f32 %v2263_v51, %v2277_v30 }
 0x1f4   : > { %v957_v17 = vpack.c.bf16 %v917_v49, %v917_v49  ;;  %v959_v3 = vpack.c.bf16 %v919_v50, %v919_v50  ;;  %v1172_v5 = vsel %vm463_vm0, %v956_v59, 0  ;;  %v1178_v26 = vsel %vm463_vm0, %v958_v60, 0 }
 0x1f5   : > { %v856_v31 = vadd.f32 %v2265_v52, %v2277_v30  ;;  %v900_v33 = vmax.f32 %v795_v27, 0.0  ;;  %v902_v34 = vmax.f32 %v866_v29, 0.0  ;;  %v896_v61 = vmax.f32 %v789_v41, 0.0  ;;  %v1026_v10 = vpop.f32.mrf.mxu0  ;;  %v1099_v13 = vpop.f32.mrf.mxu1 }
 0x1f6   : > { %1756 = vmatprep.subr.msk.bf16.mxu0 %vm463_vm0, %v957_v17  ;;  %1761 = vmatprep.subr.msk.bf16.mxu1 %vm463_vm0, %v959_v3  ;;  %v898_v32 = vmax.f32 %v860_v35, 0.0  ;;  %v947_v43 = vpack.c.bf16 %v899_v14, %v895_v9  ;;  %v892_v51 = vmax.f32 %v785_v2, 0.0  ;;  %v1900_v8 = vmov 0.0  }
 0x1f7   : > { %1192 = vmatpush1.bf16.msra.mxu0 %v1172_v5  ;;  %1265 = vmatpush1.bf16.msra.mxu1 %v1178_v26  ;;  %v948_v36 = vpack.c.bf16 %v904_v20, %v900_v33  ;;  %v950_v39 = vpack.c.bf16 %v906_v4, %v902_v34  ;;  %v894_v37 = vmax.f32 %v856_v31, 0.0  ;;  %v1028_v6 = vpop.f32.mrf.mxu0  ;;  %v1101_v7 = vpop.f32.mrf.mxu1 }
 0x1f8   : > { %1193 = vmatprep.subr.bf16.mxu0 %v953_v57  ;;  %1266 = vmatprep.subr.bf16.mxu1 %v955_v58  ;;  %v944_v52 = vpack.c.bf16 %v896_v61, %v892_v51 }
 0x1f9   : > { %v946_v30 = vpack.c.bf16 %v898_v32, %v894_v37  ;;  %v1030_v11 = vpop.f32.mrf.mxu0  ;;  %v1103_v12 = vpop.f32.mrf.mxu1 }
 0x1fb   : > { %1194 = vmatpush1.bf16.msra.mxu0 %v952_v21  ;;  %1267 = vmatpush1.bf16.msra.mxu1 %v954_v45  ;;  %v1032_v49 = vpop.f32.mrf.mxu0  ;;  %v1105_v50 = vpop.f32.mrf.mxu1 }
 0x1fc   : > { %1195 = vmatprep.subr.bf16.mxu0 %v949_v15  ;;  %1268 = vmatprep.subr.bf16.mxu1 %v951_v62 }
 0x1fd   : > { %v1109_v55 = vpop.f32.mrf.mxu1 }
 0x1ff   : > { %1196 = vmatpush1.bf16.msra.mxu0 %v948_v36  ;;  %1269 = vmatpush1.bf16.msra.mxu1 %v950_v39  ;;  %v1111_v59 = vpop.f32.mrf.mxu1 }
 0x200   : > { %1197 = vmatprep.subr.bf16.mxu0 %v945_v40  ;;  %1270 = vmatprep.subr.bf16.mxu1 %v947_v43 }
 0x201   : > { %v1113_v16 = vpop.f32.mrf.mxu1 }
 0x203   : > { %1198 = vmatpush1.bf16.msra.mxu0 %v944_v52  ;;  %1271 = vmatpush1.bf16.msra.mxu1 %v946_v30  ;;  %v1115_v1 = vpop.f32.mrf.mxu1 }
 0x205   : > { %v2349_v17 = vpop.f32.mrf.mxu1 }
 0x206   : > { %1757 = vmatmul.mubr.msk.bf16.vlgmr.msra.gmra.mxu0 %vm1158_vm3, %v1833_v47  ;;  %1762 = vmatmul.mubr.msk.bf16.vlgmr.msra.gmra.mxu1 %vm1158_vm3, %v1833_v47  ;;  %2504 = vst [vmem:[#allocation5_spill] sm:$0xff] %v2349_v17 }
 0x207   : > { %1225 = vmatprep.mubr.bf16.mxu0 %v1899_v0  ;;  %1298 = vmatprep.mubr.bf16.mxu1 %v1899_v0  ;;  %v2353_v24 = vpop.f32.mrf.mxu1 }
 0x209   : > { %v2357_v28 = vpop.f32.mrf.mxu1 }
 0x20b   : > { %v2361_v57 = vpop.f32.mrf.mxu1 }
 0x20d   : > { %v2365_v5 = vpop.f32.mrf.mxu1 }
 0x20e   : > { %1758 = vmatmul.mubr.msk.bf16.gmra.mxu0 %vm1158_vm3, %v1834_v48  ;;  %1763 = vmatmul.mubr.msk.bf16.gmra.mxu1 %vm1158_vm3, %v1834_v48 }
 0x20f   : > { %1235 = vmatprep.mubr.bf16.mxu0 %v1899_v0  ;;  %1308 = vmatprep.mubr.bf16.mxu1 %v1899_v0  ;;  %v2369_v27 = vpop.f32.mrf.mxu1 }
 0x211   : > { %v2373_v22 = vpop.f32.mrf.mxu1 }
 0x213   : > { %v2377_v41 = vpop.f32.mrf.mxu1 }
 0x214   : > { %2506 = vst [vmem:[#allocation7_spill] sm:$0xff] %v2377_v41 }
 0x216   : > { %1759 = vmatmul.mubr.msk.bf16.gmra.mxu0 %vm1158_vm3, %v1835_v44  ;;  %1764 = vmatmul.mubr.msk.bf16.gmra.mxu1 %vm1158_vm3, %v1835_v44 }
 0x217   : > { %1245 = vmatprep.mubr.bf16.mxu0 %v1899_v0  ;;  %1318 = vmatprep.mubr.bf16.mxu1 %v1899_v0  ;;  %v1036_v0 = vpop.f32.mrf.mxu0 }
 0x219   : > { %v1038_v56 = vpop.f32.mrf.mxu0 }
 0x21b   : > { %v1040_v60 = vpop.f32.mrf.mxu0 }
 0x21d   : > { %v1042_v63 = vpop.f32.mrf.mxu0 }
 0x21e   : > { %1760 = vmatmul.mubr.msk.bf16.gmra.mxu0 %vm1158_vm3, %v1836_v38  ;;  %1765 = vmatmul.mubr.msk.bf16.gmra.mxu1 %vm1158_vm3, %v1836_v38 }
 0x21f   : > { %1539 = vmatprep.mubr.f32.mxu0 %v1900_v8  ;;  %1610 = vmatprep.mubr.f32.mxu1 %v1900_v8  ;;  %v2347_v53 = vpop.f32.mrf.mxu0 }
 0x221   : > { %v2351_v3 = vpop.f32.mrf.mxu0 }
 0x223   : > { %v2355_v54 = vpop.f32.mrf.mxu0 }
 0x225   : > { %v2359_v46 = vpop.f32.mrf.mxu0 }
 0x227   : > { %v2363_v58 = vpop.f32.mrf.mxu0 }
 0x229   : > { %v2367_v26 = vpop.f32.mrf.mxu0 }
 0x22b   : > { %v2371_v29 = vpop.f32.mrf.mxu0 }
 0x22d   : > { %v2375_v23 = vpop.f32.mrf.mxu0 }
 0x22e   : > { %2505 = vst [vmem:[#allocation6_spill] sm:$0xff] %v2375_v23 }
 0x2c6   : > { %v1217_v35 = vpop.f32.mrf.mxu0  ;;  %v1290_v18 = vpop.f32.mrf.mxu1 }
 0x2c7   : > { %v1218_v32 = vadd.f32 %v1217_v35, %v1026_v10  ;;  %v1291_v36 = vadd.f32 %v1290_v18, %v1099_v13 }
 0x2c8   : > { %v1219_v19 = vpop.f32.mrf.mxu0  ;;  %v1292_v20 = vpop.f32.mrf.mxu1 }
 0x2c9   : > { %v1220_v43 = vadd.f32 %v1219_v19, %v1028_v6  ;;  %v1293_v51 = vadd.f32 %v1292_v20, %v1101_v7  ;;  %v2381_v47 = vmul.f32 0.70710677, %v1218_v32  ;;  %v2383_v8 = vmul.f32 0.70710677, %v1291_v36 }
 0x2ca   : > { %v1221_v4 = vpop.f32.mrf.mxu0  ;;  %v1294_v21 = vpop.f32.mrf.mxu1 }
 0x2cb   : > { %v1222_v37 = vadd.f32 %v1221_v4, %v1030_v11  ;;  %v1295_v48 = vadd.f32 %v1294_v21, %v1103_v12  ;;  %v2385_v13 = vmul.f32 0.70710677, %v1220_v43  ;;  %v2387_v35 = vmul.f32 0.70710677, %v1293_v51 }
 0x2cc   : > { %v1223_v45 = vpop.f32.mrf.mxu0  ;;  %v1296_v25 = vpop.f32.mrf.mxu1 }
 0x2cd   : > { %v1224_v44 = vadd.f32 %v1223_v45, %v1032_v49  ;;  %v1297_v38 = vadd.f32 %v1296_v25, %v1105_v50  ;;  %v2389_v11 = vmul.f32 0.70710677, %v1222_v37  ;;  %v2391_v20 = vmul.f32 0.70710677, %v1295_v48 }
 0x2ce   : > { %v1227_v14 = vpop.f32.mrf.mxu0  ;;  %v1300_v15 = vpop.f32.mrf.mxu1 }
 0x2cf   : > { %v1228_v17 = vadd.f32 %v1227_v14, %v1036_v0  ;;  %v1301_v41 = vadd.f32 %v1300_v15, %v1109_v55  ;;  %v2393_v0 = vmul.f32 0.70710677, %v1224_v44  ;;  %v2395_v55 = vmul.f32 0.70710677, %v1297_v38 }
 0x2d0   : > { %v1229_v62 = vpop.f32.mrf.mxu0  ;;  %v1302_v2 = vpop.f32.mrf.mxu1 }
 0x2d1   : > { %v1230_v23 = vadd.f32 %v1229_v62, %v1038_v56  ;;  %v1303_v6 = vadd.f32 %v1302_v2, %v1111_v59  ;;  %v2398_v4 = vmul.f32 0.70710677, %v1228_v17  ;;  %v2400_v21 = vmul.f32 0.70710677, %v1301_v41  ;;  %v1394_v2 = vpop.permute.xlu0 %1393 }
 0x2d2   : > { %v1231_v31 = vpop.f32.mrf.mxu0  ;;  %v1304_v33 = vpop.f32.mrf.mxu1 }
 0x2d3   : > { %v1232_v7 = vadd.f32 %v1231_v31, %v1040_v60  ;;  %v1305_v18 = vadd.f32 %v1304_v33, %v1113_v16  ;;  %v2402_v59 = vmul.f32 0.70710677, %v1230_v23  ;;  %v2405_v45 = vmul.f32 0.70710677, %v1303_v6 }
 0x2d4   : > { %v1233_v34 = vpop.f32.mrf.mxu0  ;;  %v1306_v42 = vpop.f32.mrf.mxu1 }
 0x2d5   : > { %v1234_v19 = vadd.f32 %v1233_v34, %v1042_v63  ;;  %v1307_v12 = vadd.f32 %v1306_v42, %v1115_v1  ;;  %v1399_v1 = vpop.permute.xlu1 %1398  ;;  %v2407_v25 = vmul.f32 0.70710677, %v1232_v7 }
 0x2d6   : > { %v1237_v9 = vpop.f32.mrf.mxu0  ;;  %v2379_v61 = vpop.f32.mrf.mxu1 }
 0x2d7   : > { %2507 = vst [vmem:[#allocation8_spill] sm:$0xff] %v2379_v61  ;;  %v2413_v17 = vmul.f32 0.70710677, %v1234_v19  ;;  %v2415_v41 = vmul.f32 0.70710677, %v1307_v12  ;;  %v1238_v23 = vadd.f32 %v1237_v9, %v2347_v53 }
 0x2d8   : > { %v1239_v39 = vpop.f32.mrf.mxu0  ;;  %v1312_v40 = vpop.f32.mrf.mxu1 }
 0x2d9   : > { %v1240_v56 = vadd.f32 %v1239_v39, %v2351_v3  ;;  %v1313_v60 = vadd.f32 %v1312_v40, %v2353_v24  ;;  %v2411_v3 = vmul.f32 0.70710677, %v1305_v18  ;;  %v1389_v44 = vpop.permute.xlu1 %1388 }
 0x2da   : > { %v1241_v52 = vpop.f32.mrf.mxu0  ;;  %v1314_v30 = vpop.f32.mrf.mxu1 }
 0x2db   : > { %v1346_v31 = vmul.f32 0.70710677, %v1240_v56  ;;  %v1348_v42 = vmul.f32 0.70710677, %v1313_v60  ;;  %v1242_v53 = vadd.f32 %v1241_v52, %v2355_v54  ;;  %v1315_v9 = vadd.f32 %v1314_v30, %v2357_v28  ;;  %v1384_v52 = vpop.permute.xlu0 %1383 }
 0x2dc   : > { %v1243_v61 = vpop.f32.mrf.mxu0  ;;  %v1316_v10 = vpop.f32.mrf.mxu1 }
 0x2dd   : > { %v1244_v33 = vadd.f32 %v1243_v61, %v2359_v46  ;;  %v1349_v28 = vmul.f32 0.70710677, %v1242_v53  ;;  %v1351_v30 = vmul.f32 0.70710677, %v1315_v9  ;;  %v1420_v53 = vadd.f32 %v1384_v52, %v1348_v42 }
 0x2de   : > { %v1247_v49 = vpop.f32.mrf.mxu0  ;;  %v1320_v50 = vpop.f32.mrf.mxu1  ;;  %v2511_v38 = vld [vmem:[#allocation8_spill] sm:$0xff] }
 0x2df   : > { %v1248_v34 = vadd.f32 %v1247_v49, %v2363_v58  ;;  %v2508_v58 = vld [vmem:[#allocation6_spill] sm:$0xff] }
 0x2e0   : > { %v1249_v16 = vpop.f32.mrf.mxu0  ;;  %v1322_v63 = vpop.f32.mrf.mxu1 }
 0x2e1   : > { %v1250_v14 = vadd.f32 %v1249_v16, %v2367_v26  ;;  %v1323_v15 = vadd.f32 %v1322_v63, %v2369_v27  ;;  %v1321_v26 = vadd.f32 %v1320_v50, %v2365_v5  ;;  %v1317_v27 = vadd.f32 %v1316_v10, %v2361_v57  ;;  %v2509_v5 = vld [vmem:[#allocation7_spill] sm:$0xff]  ;;  %v2510_v57 = vld [vmem:[#allocation5_spill] sm:$0xff] }
 0x2e2   : > { %v1251_v24 = vpop.f32.mrf.mxu0  ;;  %v1324_v62 = vpop.f32.mrf.mxu1  ;;  %v1350_v10 = vmul.f32 0.70710677, %v1244_v33  ;;  %v1345_v16 = vmul.f32 0.70710677, %v1238_v23 }
 0x2e3   : > { %v1252_v32 = vadd.f32 %v1251_v24, %v2371_v29  ;;  %v1325_v36 = vadd.f32 %v1324_v62, %v2373_v22  ;;  %v1354_v43 = vmul.f32 0.70710677, %v1250_v14  ;;  %v1356_v51 = vmul.f32 0.70710677, %v1323_v15 }
 0x2e4   : > { %v1253_v39 = vpop.f32.mrf.mxu0  ;;  %v1326_v40 = vpop.f32.mrf.mxu1  ;;  %v1311_v29 = vadd.f32 %v2511_v38, %v2510_v57  ;;  %v1353_v22 = vmul.f32 0.70710677, %v1248_v34  ;;  %v1355_v6 = vmul.f32 0.70710677, %v1321_v26  ;;  %v1352_v7 = vmul.f32 0.70710677, %v1317_v27 }
 0x2e5   : > { %v1357_v46 = vmul.f32 0.70710677, %v1252_v32  ;;  %v1359_v61 = vmul.f32 0.70710677, %v1325_v36  ;;  %v1254_v37 = vadd.f32 %v1253_v39, %v2508_v58  ;;  %v1327_v48 = vadd.f32 %v1326_v40, %v2509_v5  ;;  %v1379_v26 = vpop.permute.xlu1 %1378 }
 0x2e6   : > { %v1426_v49 = vadd.f32 %v1394_v2, %v1354_v43  ;;  %v1428_v50 = vadd.f32 %v1394_v2, %v1356_v51  ;;  %v1347_v63 = vmul.f32 0.70710677, %v1311_v29  ;;  %v1425_v14 = vadd.f32 %v1394_v2, %v1353_v22 }
 0x2e7   : > { %v1358_v18 = vmul.f32 0.70710677, %v1254_v37  ;;  %v1360_v54 = vmul.f32 0.70710677, %v1327_v48  ;;  %v1429_v19 = vadd.f32 %v1399_v1, %v1357_v46  ;;  %v1431_v12 = vadd.f32 %v1399_v1, %v1359_v61 }
 0x2e8   : > { %v1427_v15 = vadd.f32 %v1394_v2, %v1355_v6  ;;  %v1422_v24 = vadd.f32 %v1389_v44, %v1350_v10  ;;  %v1424_v62 = vadd.f32 %v1389_v44, %v1352_v7  ;;  %v1421_v27 = vadd.f32 %v1389_v44, %v1349_v28 }
 0x2e9   : > { %v1430_v56 = vadd.f32 %v1399_v1, %v1358_v18  ;;  %v1432_v60 = vadd.f32 %v1399_v1, %v1360_v54  ;;  %v1423_v32 = vadd.f32 %v1389_v44, %v1351_v30  ;;  %v1461_v36 = vmax.f32 %v1429_v19, 0.0  ;;  %v1374_v1 = vpop.permute.xlu0 %1373 }
 0x2ea   : > { %v1463_v39 = vmax.f32 %v1431_v12, 0.0  ;;  %v1418_v40 = vadd.f32 %v1384_v52, %v1346_v31  ;;  %v1458_v9 = vmax.f32 %v1426_v49, 0.0  ;;  %v1460_v43 = vmax.f32 %v1428_v50, 0.0 }
 0x2eb   : > { %v1462_v33 = vmax.f32 %v1430_v56, 0.0  ;;  %v1464_v34 = vmax.f32 %v1432_v60, 0.0  ;;  %v1417_v23 = vadd.f32 %v1384_v52, %v1345_v16  ;;  %v1419_v51 = vadd.f32 %v1384_v52, %v1347_v63 }
 0x2ec   : > { %v1457_v46 = vmax.f32 %v1425_v14, 0.0  ;;  %v1459_v2 = vmax.f32 %v1427_v15, 0.0  ;;  %v1414_v61 = vadd.f32 %v1379_v26, %v2413_v17  ;;  %v1416_v58 = vadd.f32 %v1379_v26, %v2415_v41  ;;  %v1369_v41 = vpop.permute.xlu1 %1368 }
 0x2ed   : > { %1491 = vmatprep.subr.mxu0 %v1462_v33  ;;  %1562 = vmatprep.subr.mxu1 %v1464_v34  ;;  %v1454_v37 = vmax.f32 %v1422_v24, 0.0  ;;  %v1456_v5 = vmax.f32 %v1424_v62, 0.0  ;;  %v1413_v31 = vadd.f32 %v1379_v26, %v2407_v25  ;;  %v1415_v42 = vadd.f32 %v1379_v26, %v2411_v3 }
 0x2ee   : > { %1492 = vmatpush1.msra.mxu0 %v1461_v36  ;;  %1563 = vmatpush1.msra.mxu1 %v1463_v39  ;;  %v1453_v48 = vmax.f32 %v1421_v27, 0.0  ;;  %v1455_v44 = vmax.f32 %v1423_v32, 0.0  ;;  %v1410_v57 = vadd.f32 %v1374_v1, %v2402_v59  ;;  %v1412_v38 = vadd.f32 %v1374_v1, %v2405_v45  ;;  %v1364_v45 = vpop.permute.xlu0 %1363 }
 0x2ef   : > { %1493 = vmatprep.subr.mxu0 %v1458_v9  ;;  %1564 = vmatprep.subr.mxu1 %v1460_v43  ;;  %v1450_v29 = vmax.f32 %v1418_v40, 0.0  ;;  %v1452_v17 = vmax.f32 %v1420_v53, 0.0  ;;  %v1409_v10 = vadd.f32 %v1374_v1, %v2398_v4  ;;  %v1411_v22 = vadd.f32 %v1374_v1, %v2400_v21 }
 0x2f0   : > { %1494 = vmatpush1.msra.mxu0 %v1457_v46  ;;  %1565 = vmatpush1.msra.mxu1 %v1459_v2  ;;  %v1449_v25 = vmax.f32 %v1417_v23, 0.0  ;;  %v1451_v6 = vmax.f32 %v1419_v51, 0.0  ;;  %v1406_v3 = vadd.f32 %v1369_v41, %v2393_v0  ;;  %v1408_v7 = vadd.f32 %v1369_v41, %v2395_v55  ;;  %v1470_v15 = vpop.permute.xlu1 %1469 }
 0x2f1   : > { %1495 = vmatprep.subr.mxu0 %v1454_v37  ;;  %1566 = vmatprep.subr.mxu1 %v1456_v5  ;;  %v1446_v59 = vmax.f32 %v1414_v61, 0.0  ;;  %v1448_v18 = vmax.f32 %v1416_v58, 0.0  ;;  %v1405_v54 = vadd.f32 %v1369_v41, %v2389_v11  ;;  %v1407_v52 = vadd.f32 %v1369_v41, %v2391_v20 }
 0x2f2   : > { %1496 = vmatpush1.msra.mxu0 %v1453_v48  ;;  %1567 = vmatpush1.msra.mxu1 %v1455_v44  ;;  %v1445_v4 = vmax.f32 %v1413_v31, 0.0  ;;  %v1447_v28 = vmax.f32 %v1415_v42, 0.0  ;;  %v1402_v21 = vadd.f32 %v1364_v45, %v2385_v13  ;;  %v1404_v30 = vadd.f32 %v1364_v45, %v2387_v35 }
 0x2f3   : > { %1497 = vmatprep.subr.mxu0 %v1450_v29  ;;  %1568 = vmatprep.subr.mxu1 %v1452_v17  ;;  %v1442_v0 = vmax.f32 %v1410_v57, 0.0  ;;  %v1444_v19 = vmax.f32 %v1412_v38, 0.0  ;;  %v1401_v55 = vadd.f32 %v1364_v45, %v2381_v47  ;;  %v1403_v12 = vadd.f32 %v1364_v45, %v2383_v8  ;;  %v1465_v8 = vld [vmem:[%s2499_s8] sm:$0xf] }
 0x2f4   : > { %1498 = vmatpush1.msra.mxu0 %v1449_v25  ;;  %1569 = vmatpush1.msra.mxu1 %v1451_v6  ;;  %v1441_v49 = vmax.f32 %v1409_v10, 0.0  ;;  %v1443_v11 = vmax.f32 %v1411_v22, 0.0  ;;  %v1438_v20 = vmax.f32 %v1406_v3, 0.0  ;;  %v1440_v50 = vmax.f32 %v1408_v7, 0.0 }
 0x2f5   : > { %1499 = vmatprep.subr.mxu0 %v1446_v59  ;;  %1570 = vmatprep.subr.mxu1 %v1448_v18  ;;  %v1437_v56 = vmax.f32 %v1405_v54, 0.0  ;;  %v1439_v13 = vmax.f32 %v1407_v52, 0.0  ;;  %v1434_v35 = vmax.f32 %v1402_v21, 0.0  ;;  %v1436_v60 = vmax.f32 %v1404_v30, 0.0 }
 0x2f6   : > { %1500 = vmatpush1.msra.mxu0 %v1445_v4  ;;  %1571 = vmatpush1.msra.mxu1 %v1447_v28  ;;  %v1433_v47 = vmax.f32 %v1401_v55, 0.0  ;;  %v1435_v16 = vmax.f32 %v1403_v12, 0.0 }
 0x2f7   : > { %1501 = vmatprep.subr.mxu0 %v1442_v0  ;;  %1572 = vmatprep.subr.mxu1 %v1444_v19 }
 0x2f8   : > { %1502 = vmatpush1.msra.mxu0 %v1441_v49  ;;  %1573 = vmatpush1.msra.mxu1 %v1443_v11 }
 0x2f9   : > { %1503 = vmatprep.subr.mxu0 %v1438_v20  ;;  %1574 = vmatprep.subr.mxu1 %v1440_v50 }
 0x2fa   : > { %1504 = vmatpush1.msra.mxu0 %v1437_v56  ;;  %1575 = vmatpush1.msra.mxu1 %v1439_v13 }
 0x2fb   : > { %1505 = vmatprep.subr.mxu0 %v1434_v35  ;;  %1576 = vmatprep.subr.mxu1 %v1436_v60 }
 0x2fc   : > { %1506 = vmatpush1.msra.mxu0 %v1433_v47  ;;  %1577 = vmatpush1.msra.mxu1 %v1435_v16 }
 0x2fd   : > { %1766 = vmatmul.mubr.msk.f32.vlgmr.msra.gmra.mxu0 %vm737_vm2, %v1465_v8  ;;  %1767 = vmatmul.mubr.msk.f32.vlgmr.msra.gmra.mxu1 %vm737_vm2, %v1465_v8 }
 0x3bd   : > { %v1541_v63 = vpop.f32.mrf.mxu0  ;;  %v1612_v14 = vpop.f32.mrf.mxu1 }
 0x3be   : > { %v1542_v33 = vadd.f32 %v1541_v63, %v1470_v15  ;;  %v1613_v34 = vadd.f32 %v1612_v14, %v1470_v15 }
 0x3bf   : > { %v1543_v24 = vpop.f32.mrf.mxu0  ;;  %v1614_v62 = vpop.f32.mrf.mxu1 }
 0x3c0   : > { %v1544_v26 = vadd.f32 %v1543_v24, %v1470_v15  ;;  %v1615_v27 = vadd.f32 %v1614_v62, %v1470_v15 }
 0x3c2   : > { %v1621_v32 = vcombine.low %v1542_v33, %v1544_v26  ;;  %v1622_v36 = vcombine.low %v1613_v34, %v1615_v27 }
 0x3c4   : > { %1625 = vst [vmem:[%s353_s27] sm:$0xff] %v1621_v32  ;;  %1626 = vst [vmem:[%s353_s27 + $0x8] sm:$0xff] %v1622_v36 }
 0x3c5   : > { %1850 = shalt.err (!%p1847_p3)
}
 0x3c6   : > { %s1851_s26 = scalar_lea.hbm %s2456_s11, 256  ;;  %s1855_s29 = scalar_lea.hbm %s2501_s10, 1024 }
 0x3c7   : > { %p1852_p4 = scmp.ne.s32.totalorder %s2456_s11, %s1851_s26  ;;  %p1856_p9 = scmp.lt.s32.totalorder %s2456_s11, %s2501_s10 }
 0x3c8   : > { %p1857_p10 = scmp.lt.s32.totalorder %s1855_s29, %s1851_s26 }
 0x3c9   : > { %p1853_p7 = pnand %p1852_p4, %p1995_p5 }
 0x3ca   : > { %p1858_p11 = por %p1857_p10, %p1856_p9 }
 0x3cb   : > { %p1854_p8 = pneg %p1853_p7 }
 0x3cd   : > { %p1859_p12 = pnand %p1858_p11, %p1854_p8 }
 0x3cf   : > { %1862 = shalt.err (!%p1859_p12)
}
 0x3d0   : > { %1774 = dma.vmem_to_hbm [thread:$0]  (%p1995_p5), %s1643_s28, 256, %s2456_s11, %s1628_s12  }
 0x3d1 PF: > { %p1780_p13 = scmp.ge.s32.totalorder %s1897_s16, 2  ;;  %s1654_s18 = sand.u32 1, %s1885_s13  }
 0x3d2   : > { %s1655_s20 = scalar_lea.sflag [#allocation3], %s1654_s18 }
 0x3d3   : > { %p1777_p0 = pnand %p1780_p13, %p1999_p6 }
 0x3d5   : > { %p1778_p1 = pneg %p1777_p0 }
 0x3d7   : > { %1880 = dma.done.wait (%p1778_p1), %s1655_s20, 256  }
 0x3d8   : > { %1882 = vsyncadd (%p1778_p1), %s1655_s20, 4294967040  ;;  %p20_p2 = scmp.ge.s32.totalorder %s1982_s19, 6   ;;  %s2512_s13 = smov %s1889_s14 }
 0x3d9   : > { %s2513_s14 = smov %s1893_s15  ;;  %s2514_s15 = smov %s1993_s22 }
 0x3da   : > { %s2515_s16 = smov %s1982_s19  ;;  %22 = sbr.rel (!%p20_p2) target bundleno = 3 (0x3), region = 95 }
 0x3df   :  { %1660 = vsyncpa [#allocation3], 1 }
 0x3e0   :  { %1662 = vsyncpa [#allocation3 + $0x1], 1 }

</bundles_post_ra>
